<compile_context>
chip_gen: v7x
topology: tpu7x:2x2x1
jax: 0.10.0
libtpu: 0.0.40
codegen_flags: <defaults>
</compile_context>

<pallas_src>
import math

import jax
import jax.numpy as jnp
from jax.experimental import pallas as pl
from jax.experimental.pallas import tpu as pltpu


_LN_EPS = 1e-5


def _round_up(x, m):
    return (x + m - 1) // m * m


def _vmem_budget():
    """(vmem_limit_bytes, tile-picking budget) derived from the actual chip."""
    try:
        cap = int(pltpu.get_tpu_info().vmem_capacity_bytes)
    except Exception:
        cap = 64 * 1024 * 1024                       # conservative (v7x per-TC VMEM)
    vmem_limit = min(cap * 3 // 4, 96 * 1024 * 1024)  # 48 MiB on v7x, 96 MiB v5e/v6e
    budget = max(vmem_limit - 8 * 1024 * 1024, 8 * 1024 * 1024)
    return vmem_limit, budget


def _pick_tile_rows(n_rows, k, f, *, x_bytes, w_bytes, out_bytes, norm,
                    budget_bytes, cap=8192):
    """Largest row tile (multiple of 8, <= cap) fitting a double-buffered
    pipeline plus resident constants and the norm-path f32 temporaries."""
    kl = _round_up(k, 128)                 # VMEM lane padding
    fl = _round_up(f, 128)
    # Resident constants; assume double-buffered as a worst case (the caller
    # attempts to single-buffer them with pl.Buffered(1)).
    fixed = 2 * (kl * fl * w_bytes + fl * 4)
    if norm:
        fixed += 2 * 2 * kl * 4            # gamma_rep / beta_rep
    # Per-row footprint: in/out blocks (x2 buffers) + accumulator + temporaries.
    per_row = 2 * (kl * x_bytes + fl * out_bytes) + fl * 4
    per_row += 6 * kl * 4 if norm else 2 * kl * 4
    avail = max(budget_bytes - fixed, 8 * per_row)
    tile = int(min(cap, avail // per_row))
    tile = max(8, (tile // 8) * 8)
    if n_rows <= tile:
        return int(n_rows)                 # single full-extent block
    return tile


def _make_kernel(norm, sf, feat_in, mxu_dtype):
    """Fused (LayerNorm) + projection kernel over a (TILE_N, K) row tile."""
    inv_h = 1.0 / float(feat_in)

    if not norm:
        def kernel(x_ref, w_ref, b_ref, o_ref):
            # Cast on the VPU (hidden under DMA) instead of a wrapper XLA pass.
            x = x_ref[...].astype(mxu_dtype)
            acc = jnp.dot(x, w_ref[...], preferred_element_type=jnp.float32)
            o_ref[...] = (acc + b_ref[...].astype(jnp.float32)).astype(o_ref.dtype)
        return kernel

    def kernel(x_ref, w_ref, b_ref, g_ref, be_ref, o_ref):
        xf = x_ref[...].astype(jnp.float32)                      # (TN, K) f32 stats
        k = xf.shape[-1]
        # Lanes [j*H, (j+1)*H) belong to stacked frame j.
        lane_frame = jax.lax.broadcasted_iota(jnp.int32, (1, k), 1) // feat_in
        yf = jnp.zeros_like(xf)
        for j in range(sf):                                      # static unroll (sf small)
            m = (lane_frame == j).astype(jnp.float32)            # (1, K) frame mask
            mean = jnp.sum(xf * m, axis=-1, keepdims=True) * inv_h
            c = (xf - mean) * m                                  # centered, masked
            var = jnp.sum(c * c, axis=-1, keepdims=True) * inv_h  # two-pass variance
            yf = yf + c * jax.lax.rsqrt(var + _LN_EPS)
        yf = yf * g_ref[...].astype(jnp.float32) + be_ref[...].astype(jnp.float32)
        # MXU operands in bf16 (f32 accumulate) regardless of the I/O dtype.
        acc = jnp.dot(yf.astype(mxu_dtype), w_ref[...],
                      preferred_element_type=jnp.float32)
        o_ref[...] = (acc + b_ref[...].astype(jnp.float32)).astype(o_ref.dtype)

    return kernel


def _stacked_projection(x2d, w, b2d, *, norm, gamma_rep, beta_rep, sf, feat_in,
                        out_dtype, mxu_dtype, max_tile_rows=None):
    """y2d = (LN?(x2d)) @ w + b, row-tiled with VMEM-resident constants."""
    n, k = x2d.shape
    f = w.shape[1]
    out_bytes = jnp.dtype(out_dtype).itemsize

    vmem_limit, budget = _vmem_budget()
    tile = _pick_tile_rows(n, k, f,
                           x_bytes=x2d.dtype.itemsize,
                           w_bytes=w.dtype.itemsize,
                           out_bytes=out_bytes,
                           norm=norm, budget_bytes=budget)
    if max_tile_rows is not None:
        tile = min(tile, max(8, (int(max_tile_rows) // 8) * 8))
    if tile >= n:
        tile = n

    grid = (pl.cdiv(n, tile),)

    operands = [x2d, w, b2d]
    flops = 2 * n * k * f
    transcendentals = 0
    if norm:
        operands += [gamma_rep, beta_rep]
        flops += 10 * n * k * sf
        transcendentals = n * sf
    bytes_accessed = (n * k * x2d.dtype.itemsize
                      + k * f * w.dtype.itemsize
                      + n * f * out_bytes)

    kernel = _make_kernel(norm, sf, feat_in, mxu_dtype)

    def run(single_buffer_consts):
        const_kwargs = {}
        if single_buffer_consts:
            # Grid-invariant operands never get re-fetched; one buffer suffices.
            const_kwargs = dict(pipeline_mode=pl.Buffered(1))

        def const_spec(shape):
            return pl.BlockSpec(shape, lambda i: (0, 0), **const_kwargs)

        in_specs = [pl.BlockSpec((tile, k), lambda i: (i, 0)),
                    const_spec((k, f)), const_spec((1, f))]
        if norm:
            in_specs += [const_spec((1, k)), const_spec((1, k))]

        return pl.pallas_call(
            kernel,
            out_shape=jax.ShapeDtypeStruct((n, f), out_dtype),
            grid=grid,
            in_specs=in_specs,
            out_specs=pl.BlockSpec((tile, f), lambda i: (i, 0)),
            compiler_params=pltpu.CompilerParams(
                dimension_semantics=("parallel",),
                vmem_limit_bytes=int(vmem_limit)),
            cost_estimate=pl.CostEstimate(
                flops=int(flops),
                transcendentals=int(transcendentals),
                bytes_accessed=int(bytes_accessed)),
        )(*operands)

    if hasattr(pl, "Buffered"):
        try:
            return run(True)
        except Exception:
            pass                      # fall back to default double-buffering
    return run(False)


class StackingSubsampling:
    """JAX/Pallas port of NeMo's StackingSubsampling forward pass."""

    def __init__(self, subsampling_factor, feat_in, feat_out, norm=False,
                 key=None, mxu_dtype=jnp.bfloat16, out_dtype=None,
                 max_tile_rows=None):
        self.subsampling_factor = int(subsampling_factor)
        self.feat_in = int(feat_in)
        self.feat_out = int(feat_out)
        self.norm = bool(norm)
        self.mxu_dtype = mxu_dtype
        self.out_dtype = out_dtype            # None -> follow input dtype
        self.max_tile_rows = max_tile_rows

        if key is None:
            key = jax.random.PRNGKey(0)
        k_w, k_b = jax.random.split(key)
        k_in = self.subsampling_factor * self.feat_in
        bound = 1.0 / math.sqrt(k_in)
        # torch.nn.Linear stores weight as (out, in); we keep (in, out) so the
        # kernel output last dim (feat_out) sits on lanes.
        self.w = jax.random.uniform(k_w, (k_in, self.feat_out),
                                    jnp.float32, -bound, bound)
        self.b = jax.random.uniform(k_b, (self.feat_out,),
                                    jnp.float32, -bound, bound)

        # Kernel-side constants: weight in the MXU compute dtype, bias in f32.
        self._w_kernel = self.w.astype(self.mxu_dtype)
        self._b_kernel = self.b.reshape(1, self.feat_out).astype(jnp.float32)

        if self.norm:
            # torch.nn.LayerNorm init: weight=1, bias=0
            self.ln_gamma = jnp.ones((self.feat_in,), jnp.float32)
            self.ln_beta = jnp.zeros((self.feat_in,), jnp.float32)
            # gamma/beta broadcast over the sf stacked frames -> (1, sf*H)
            self._gamma_rep = jnp.tile(self.ln_gamma,
                                       self.subsampling_factor).reshape(1, k_in)
            self._beta_rep = jnp.tile(self.ln_beta,
                                      self.subsampling_factor).reshape(1, k_in)
        else:
            self._gamma_rep = None
            self._beta_rep = None

    def get_sampling_frames(self):
        return self.subsampling_factor

    def get_streaming_cache_size(self):
        return 0

    def __call__(self, x, lengths):
        b, t, h = x.shape
        sf = self.subsampling_factor
        pad_size = (-t) % sf
        if pad_size:
            # TODO(synk): fold the time padding into the kernel (row mask /
            # per-batch index_map) to remove this single fused XLA pad pass.
            x = jnp.pad(x, ((0, 0), (0, pad_size), (0, 0)))
        t_out = (t + pad_size) // sf
        k_in = sf * h

        # Free (contiguous) reshape; the compute-dtype cast happens in-kernel.
        x2d = x.reshape(b * t_out, k_in)
        out_dtype = self.out_dtype if self.out_dtype is not None else x.dtype

        y2d = _stacked_projection(
            x2d, self._w_kernel, self._b_kernel,
            norm=self.norm, gamma_rep=self._gamma_rep, beta_rep=self._beta_rep,
            sf=sf, feat_in=h, out_dtype=out_dtype, mxu_dtype=self.mxu_dtype,
            max_tile_rows=self.max_tile_rows)

        y = y2d.reshape(b, t_out, self.feat_out)
        lengths = (lengths + pad_size) // sf
        return y, lengths


# ----------------------------- reference (pure JAX) --------------------------

def _reference_forward(mod, x, lengths):
    sf = mod.subsampling_factor
    b, t, h = x.shape
    pad = (-t) % sf
    xp = jnp.pad(x, ((0, 0), (0, pad), (0, 0))).astype(jnp.float32)
    if mod.norm:
        mean = xp.mean(-1, keepdims=True)
        var = ((xp - mean) ** 2).mean(-1, keepdims=True)
        xp = (xp - mean) * jax.lax.rsqrt(var + _LN_EPS) * mod.ln_gamma + mod.ln_beta
    t_out = (t + pad) // sf
    xs = xp.reshape(b, t_out, sf * h)
    y = jnp.einsum("btk,kf->btf", xs, mod.w,
                   precision=jax.lax.Precision.HIGHEST) + mod.b
    return y.astype(x.dtype), (lengths + pad) // sf


# ---------------------------------- main --------------------------------------

if __name__ == "__main__":
    key = jax.random.PRNGKey(0)
    k_x1, k_x2, k_p1, k_p2 = jax.random.split(key, 4)

    FEAT_IN, FEAT_OUT, SF = 32, 32, 4

    # Case 1: norm=False, f32 I/O, T not a multiple of sf (padding path),
    # single full-extent row block, bf16 MXU operands, exact-width (masked)
    # output stores since feat_out % 128 != 0.
    B1, T1 = 2, 7
    x1 = jax.random.normal(k_x1, (B1, T1, FEAT_IN), jnp.float32)
    len1 = jnp.array([7, 5], jnp.int32)
    mod1 = StackingSubsampling(SF, FEAT_IN, FEAT_OUT, norm=False, key=k_p1)
    y1, nl1 = mod1(x1, len1)
    jax.block_until_ready((y1, nl1))
    y1_ref, nl1_ref = _reference_forward(mod1, x1, len1)
    assert y1.shape == y1_ref.shape
    assert jnp.allclose(y1, y1_ref, atol=3e-2, rtol=3e-2), "no-norm path mismatch"
    assert jnp.array_equal(nl1, nl1_ref)

    # Case 2: norm=True (fused LayerNorm with lane-masked reductions), multiple
    # row tiles including a partial final tile (max_tile_rows=8, N = 3*6 = 18).
    B2, T2 = 3, 21
    x2 = jax.random.normal(k_x2, (B2, T2, FEAT_IN), jnp.float32)
    len2 = jnp.array([21, 13, 8], jnp.int32)
    mod2 = StackingSubsampling(SF, FEAT_IN, FEAT_OUT, norm=True, key=k_p2,
                               max_tile_rows=8)
    y2, nl2 = mod2(x2, len2)
    jax.block_until_ready((y2, nl2))
    y2_ref, nl2_ref = _reference_forward(mod2, x2, len2)
    assert y2.shape == y2_ref.shape
    assert jnp.allclose(y2, y2_ref, atol=3e-2, rtol=3e-2), "fused LN path mismatch"
    assert jnp.array_equal(nl2, nl2_ref)

    print("KERNEL_OK")
</pallas_src>

<mosaic_0001>
module attributes {stable_mosaic.version = 11 : i64} {
  func.func @kernel(%arg0: i32, %arg1: memref<4x128xf32, #tpu.memory_space<vmem>>, %arg2: memref<128x32xbf16, #tpu.memory_space<vmem>>, %arg3: memref<1x32xf32, #tpu.memory_space<vmem>>, %arg4: memref<4x32xf32, #tpu.memory_space<vmem>>) attributes {dimension_semantics = [#tpu.dimension_semantics<parallel>], iteration_bounds = array<i64: 1>, scalar_prefetch = 0 : i64, scratch_operands = 0 : i64, tpu.core_type = #tpu.core_type<tc>, window_params = [{transform_indices = @transform_0, window_bounds = array<i64: 4, 128>}, {pipeline_mode = #tpu.pipeline_mode<synchronous>, transform_indices = @transform_1, window_bounds = array<i64: 128, 32>}, {pipeline_mode = #tpu.pipeline_mode<synchronous>, transform_indices = @transform_2, window_bounds = array<i64: 1, 32>}, {transform_indices = @transform_3, window_bounds = array<i64: 4, 32>}]} {
    %c0 = arith.constant 0 : index
    %c0_0 = arith.constant 0 : index
    %0 = vector.load %arg1[%c0, %c0_0] : memref<4x128xf32, #tpu.memory_space<vmem>>, vector<4x128xf32>
    %1 = arith.truncf %0 : vector<4x128xf32> to vector<4x128xbf16>
    %c0_1 = arith.constant 0 : index
    %c0_2 = arith.constant 0 : index
    %2 = vector.load %arg2[%c0_1, %c0_2] : memref<128x32xbf16, #tpu.memory_space<vmem>>, vector<128x32xbf16>
    %cst = arith.constant dense<0.000000e+00> : vector<4x32xf32>
    %3 = tpu.matmul %1, %2, %cst {dimension_numbers = #tpu.dot_dimension_numbers<[1], [0], [0], [1], [0, 0, 1, 1], [], []>} : vector<4x128xbf16>, vector<128x32xbf16>, vector<4x32xf32> -> vector<4x32xf32>
    %c0_3 = arith.constant 0 : index
    %c0_4 = arith.constant 0 : index
    %4 = vector.load %arg3[%c0_3, %c0_4] : memref<1x32xf32, #tpu.memory_space<vmem>>, vector<1x32xf32>
    %5 = vector.broadcast %4 : vector<1x32xf32> to vector<4x32xf32>
    %6 = arith.addf %3, %5 : vector<4x32xf32>
    %c0_5 = arith.constant 0 : index
    %c0_6 = arith.constant 0 : index
    %7 = vector.load %arg4[%c0_5, %c0_6] : memref<4x32xf32, #tpu.memory_space<vmem>>, vector<4x32xf32>
    tpu.vector_store %arg4[%c0_5, %c0_6], %6 {strides = array<i32>} : memref<4x32xf32, #tpu.memory_space<vmem>>, vector<4x32xf32>,
    return
  }
  func.func @transform_0(%arg0: i32) -> (i32, i32) {
    %c0_i32 = arith.constant 0 : i32
    %c0_i32_0 = arith.constant 0 : i32
    return %arg0, %c0_i32 : i32, i32
  }
  func.func @transform_1(%arg0: i32) -> (i32, i32) {
    %c0_i32 = arith.constant 0 : i32
    %c0_i32_0 = arith.constant 0 : i32
    %c0_i32_1 = arith.constant 0 : i32
    return %c0_i32, %c0_i32_0 : i32, i32
  }
  func.func @transform_2(%arg0: i32) -> (i32, i32) {
    %c0_i32 = arith.constant 0 : i32
    %c0_i32_0 = arith.constant 0 : i32
    %c0_i32_1 = arith.constant 0 : i32
    return %c0_i32, %c0_i32_0 : i32, i32
  }
  func.func @transform_3(%arg0: i32) -> (i32, i32) {
    %c0_i32 = arith.constant 0 : i32
    %c0_i32_0 = arith.constant 0 : i32
    return %arg0, %c0_i32 : i32, i32
  }
}

module attributes {stable_mosaic.version = 11 : i64} {
  func.func @kernel(%arg0: i32, %arg1: memref<4x128xf32, #tpu.memory_space<vmem>>, %arg2: memref<128x32xbf16, #tpu.memory_space<vmem>>, %arg3: memref<1x32xf32, #tpu.memory_space<vmem>>, %arg4: memref<4x32xf32, #tpu.memory_space<vmem>>) attributes {dimension_semantics = [#tpu.dimension_semantics<parallel>], iteration_bounds = array<i64: 1>, scalar_prefetch = 0 : i64, scratch_operands = 0 : i64, tpu.core_type = #tpu.core_type<tc>, window_params = [{transform_indices = @transform_0, window_bounds = array<i64: 4, 128>}, {pipeline_mode = #tpu.pipeline_mode<synchronous>, transform_indices = @transform_1, window_bounds = array<i64: 128, 32>}, {pipeline_mode = #tpu.pipeline_mode<synchronous>, transform_indices = @transform_2, window_bounds = array<i64: 1, 32>}, {transform_indices = @transform_3, window_bounds = array<i64: 4, 32>}]} {
    %c0 = arith.constant 0 : index
    %c0_0 = arith.constant 0 : index
    %0 = vector.load %arg1[%c0, %c0_0] : memref<4x128xf32, #tpu.memory_space<vmem>>, vector<4x128xf32>
    %1 = arith.truncf %0 : vector<4x128xf32> to vector<4x128xbf16>
    %c0_1 = arith.constant 0 : index
    %c0_2 = arith.constant 0 : index
    %2 = vector.load %arg2[%c0_1, %c0_2] : memref<128x32xbf16, #tpu.memory_space<vmem>>, vector<128x32xbf16>
    %cst = arith.constant dense<0.000000e+00> : vector<4x32xf32>
    %3 = tpu.matmul %1, %2, %cst {dimension_numbers = #tpu.dot_dimension_numbers<[1], [0], [0], [1], [0, 0, 1, 1], [], []>} : vector<4x128xbf16>, vector<128x32xbf16>, vector<4x32xf32> -> vector<4x32xf32>
    %c0_3 = arith.constant 0 : index
    %c0_4 = arith.constant 0 : index
    %4 = vector.load %arg3[%c0_3, %c0_4] : memref<1x32xf32, #tpu.memory_space<vmem>>, vector<1x32xf32>
    %5 = vector.broadcast %4 : vector<1x32xf32> to vector<4x32xf32>
    %6 = arith.addf %3, %5 : vector<4x32xf32>
    %c0_5 = arith.constant 0 : index
    %c0_6 = arith.constant 0 : index
    %7 = vector.load %arg4[%c0_5, %c0_6] : memref<4x32xf32, #tpu.memory_space<vmem>>, vector<4x32xf32>
    tpu.vector_store %arg4[%c0_5, %c0_6], %6 {strides = array<i32>} : memref<4x32xf32, #tpu.memory_space<vmem>>, vector<4x32xf32>,
    return
  }
  func.func @transform_0(%arg0: i32) -> (i32, i32) {
    %c0_i32 = arith.constant 0 : i32
    %c0_i32_0 = arith.constant 0 : i32
    return %arg0, %c0_i32 : i32, i32
  }
  func.func @transform_1(%arg0: i32) -> (i32, i32) {
    %c0_i32 = arith.constant 0 : i32
    %c0_i32_0 = arith.constant 0 : i32
    %c0_i32_1 = arith.constant 0 : i32
    return %c0_i32, %c0_i32_0 : i32, i32
  }
  func.func @transform_2(%arg0: i32) -> (i32, i32) {
    %c0_i32 = arith.constant 0 : i32
    %c0_i32_0 = arith.constant 0 : i32
    %c0_i32_1 = arith.constant 0 : i32
    return %c0_i32, %c0_i32_0 : i32, i32
  }
  func.func @transform_3(%arg0: i32) -> (i32, i32) {
    %c0_i32 = arith.constant 0 : i32
    %c0_i32_0 = arith.constant 0 : i32
    return %arg0, %c0_i32 : i32, i32
  }
}

</mosaic_0001>

<bundles_post_ra>
// kernel: tpu_custom_call.1
= control target key start
LH: loop header
LB: loop body
LE: loop exit
PB: predicated region body
PF: predicated region fallthrough
CT: control target
= control target key end

     0   :  { %v218_v1 = vmov 0.0   ;;  %vm219_vm0 = vmmov 0   ;;  %s283_s0 = inlined_call_operand.vmem [shape: f32[4,128], index: 0, kind: input, shape index: {}]   ;;  %s284_s1 = inlined_call_operand.vmem [shape: bf16[128,32], index: 1, kind: input, shape index: {}]   ;;  %s285_s2 = inlined_call_operand.vmem [shape: f32[1,32], index: 2, kind: input, shape index: {}]   ;;  %s286_s3 = inlined_call_operand.hbm [shape: f32[4,32], index: 3, kind: output, shape index: {}]  }
   0x1   :  { %v186_v0 = vld [vmem:[%s284_s1] sm:$0xff]   ;;  %163 = vmatprep.subr.bf16.mxu0 %v218_v1  ;;  %v187_v2 = vld [vmem:[%s284_s1 + $0x8] sm:$0xff]   ;;  %179 = vmatprep.mubr.msk.bf16.mxu0 %vm219_vm0, %v218_v1  ;;  %v188_v3 = vld [vmem:[%s284_s1 + $0x10] sm:$0xff]  }
   0x2   :  { %164 = vmatpush3.bf16.msra.mxu0 %v186_v0 }
   0x3   :  { %165 = vmatprep.subr.bf16.mxu0 %v218_v1 }
   0x6   :  { %166 = vmatpush3.bf16.msra.mxu0 %v187_v2 }
   0x7   :  { %167 = vmatprep.subr.bf16.mxu0 %v218_v1 }
   0x8   :  { %8 = vsyncpa [#allocation3], 0  ;;  %v189_v4 = vld [vmem:[%s284_s1 + $0x18] sm:$0xff]   ;;  %v190_v5 = vld [vmem:[%s284_s1 + $0x20] sm:$0xff]   ;;  %s220_s5 = smov [#allocation2]   ;;  %vm129_vm1 = vcmask 257024  }
   0x9   :  { %v191_v6 = vld [vmem:[%s284_s1 + $0x28] sm:$0xff]   ;;  %v192_v7 = vld [vmem:[%s284_s1 + $0x30] sm:$0xff]   ;;  %v193_v8 = vld [vmem:[%s284_s1 + $0x38] sm:$0xff]   ;;  %s137_s6 = sshll.u32 %s220_s5, 4  ;;  %s138_s6 = int_to_ptr.vmem [resolvable:$true] %s137_s6 }
   0xa   :  { %168 = vmatpush3.bf16.msra.mxu0 %v188_v3  ;;  %v16_v9 = vld [vmem:[%s283_s0] sm:$0xf]  ;;  %s194_s1 = scalar_lea.vmem %s138_s6, 64  ;;  %p199_p1 = scmp.lt.s32.totalorder %s138_s6, %s138_s6 }
   0xb   :  { %169 = vmatprep.subr.bf16.mxu0 %v218_v1  ;;  %v17_v10 = vpack.c.bf16 %v16_v9, %v16_v9  ;;  %v145_v11 = vld [vmem:[%s285_s2] ss:$0 sm:$0xff]  ;;  %p195_p0 = scmp.ne.s32.totalorder %s138_s6, %s194_s1  ;;  %p200_p2 = scmp.lt.s32.totalorder %s194_s1, %s194_s1 }
   0xd   :  { %p201_p3 = por %p200_p2, %p199_p1 }
   0xe   :  { %170 = vmatpush3.bf16.msra.mxu0 %v189_v4 }
   0xf   :  { %171 = vmatprep.subr.bf16.mxu0 %v218_v1  ;;  %p202_p4 = pnand %p201_p3, %p195_p0 }
  0x12   :  { %172 = vmatpush3.bf16.msra.mxu0 %v190_v5 }
  0x13   :  { %173 = vmatprep.subr.bf16.mxu0 %v218_v1 }
  0x16   :  { %174 = vmatpush3.bf16.msra.mxu0 %v191_v6 }
  0x17   :  { %175 = vmatprep.subr.bf16.mxu0 %v218_v1 }
  0x1a   :  { %176 = vmatpush3.bf16.msra.mxu0 %v192_v7 }
  0x1b   :  { %177 = vmatprep.subr.bf16.mxu0 %v218_v1 }
  0x1e   :  { %178 = vmatpush3.bf16.msra.mxu0 %v193_v8 }
  0x21   :  { %180 = vmatmul.mubr.bf16.vlgmr.msra.gmra.mrb[0].mxu0 %v17_v10 }
  0xf4   :  { %v123_v12 = vpop.f32.mrb[0].mxu0 }
  0xf5   :  { %v124_v13 = vadd.f32 %v145_v11, %v123_v12  ;;  %v181_v14 = vpop.f32.mrb[1].mxu0 }
  0xf6   :  { %v126_v15 = vpop.f32.mrb[2].mxu0 }
  0xf7   :  { %v182_v16 = vpop.f32.mrb[3].mxu0  ;;  %130 = vst.msk [vmem:[#allocation2] sm:$0xf] %vm129_vm1, %v124_v13 }
  0xf8   :  { %205 = shalt.err (!%p202_p4)
}
  0xf9   :  { %s206_s2 = scalar_lea.hbm %s286_s3, 64 }
  0xfa   :  { %p207_p5 = scmp.ne.s32.totalorder %s286_s3, %s206_s2  ;;  %p210_p6 = scmp.lt.u32.totalorder %s206_s2, %s286_s3 }
  0xfc   :  { %p212_p7 = pnand %p210_p6, %p207_p5 }
  0xfe   :  { %215 = shalt.err (!%p212_p7)
}
  0xff   :  { %140 = dma.vmem_to_hbm [thread:$0]  %s138_s6, 64, %s286_s3, [#allocation3]  }
 0x100   :  { %216 = dma.done.wait [#allocation3], 64  }
 0x101   :  { %217 = vsyncadd [#allocation3], 4294967232 }
 0x102   :  { %144 = vsyncpa [#allocation3], 1 }

// kernel: tpu_custom_call.1
= control target key start
LH: loop header
LB: loop body
LE: loop exit
PB: predicated region body
PF: predicated region fallthrough
CT: control target
= control target key end

     0   :  { %v218_v1 = vmov 0.0   ;;  %vm219_vm0 = vmmov 0   ;;  %s283_s0 = inlined_call_operand.vmem [shape: f32[4,128], index: 0, kind: input, shape index: {}]   ;;  %s284_s1 = inlined_call_operand.vmem [shape: bf16[128,32], index: 1, kind: input, shape index: {}]   ;;  %s285_s2 = inlined_call_operand.vmem [shape: f32[1,32], index: 2, kind: input, shape index: {}]   ;;  %s286_s3 = inlined_call_operand.hbm [shape: f32[4,32], index: 3, kind: output, shape index: {}]  }
   0x1   :  { %v186_v0 = vld [vmem:[%s284_s1] sm:$0xff]   ;;  %163 = vmatprep.subr.bf16.mxu0 %v218_v1  ;;  %v187_v2 = vld [vmem:[%s284_s1 + $0x8] sm:$0xff]   ;;  %179 = vmatprep.mubr.msk.bf16.mxu0 %vm219_vm0, %v218_v1  ;;  %v188_v3 = vld [vmem:[%s284_s1 + $0x10] sm:$0xff]  }
   0x2   :  { %164 = vmatpush3.bf16.msra.mxu0 %v186_v0 }
   0x3   :  { %165 = vmatprep.subr.bf16.mxu0 %v218_v1 }
   0x6   :  { %166 = vmatpush3.bf16.msra.mxu0 %v187_v2 }
   0x7   :  { %167 = vmatprep.subr.bf16.mxu0 %v218_v1 }
   0x8   :  { %8 = vsyncpa [#allocation3], 0  ;;  %v189_v4 = vld [vmem:[%s284_s1 + $0x18] sm:$0xff]   ;;  %v190_v5 = vld [vmem:[%s284_s1 + $0x20] sm:$0xff]   ;;  %s220_s5 = smov [#allocation2]   ;;  %vm129_vm1 = vcmask 257024  }
   0x9   :  { %v191_v6 = vld [vmem:[%s284_s1 + $0x28] sm:$0xff]   ;;  %v192_v7 = vld [vmem:[%s284_s1 + $0x30] sm:$0xff]   ;;  %v193_v8 = vld [vmem:[%s284_s1 + $0x38] sm:$0xff]   ;;  %s137_s6 = sshll.u32 %s220_s5, 4  ;;  %s138_s6 = int_to_ptr.vmem [resolvable:$true] %s137_s6 }
   0xa   :  { %168 = vmatpush3.bf16.msra.mxu0 %v188_v3  ;;  %v16_v9 = vld [vmem:[%s283_s0] sm:$0xf]  ;;  %s194_s1 = scalar_lea.vmem %s138_s6, 64  ;;  %p199_p1 = scmp.lt.s32.totalorder %s138_s6, %s138_s6 }
   0xb   :  { %169 = vmatprep.subr.bf16.mxu0 %v218_v1  ;;  %v17_v10 = vpack.c.bf16 %v16_v9, %v16_v9  ;;  %v145_v11 = vld [vmem:[%s285_s2] ss:$0 sm:$0xff]  ;;  %p195_p0 = scmp.ne.s32.totalorder %s138_s6, %s194_s1  ;;  %p200_p2 = scmp.lt.s32.totalorder %s194_s1, %s194_s1 }
   0xd   :  { %p201_p3 = por %p200_p2, %p199_p1 }
   0xe   :  { %170 = vmatpush3.bf16.msra.mxu0 %v189_v4 }
   0xf   :  { %171 = vmatprep.subr.bf16.mxu0 %v218_v1  ;;  %p202_p4 = pnand %p201_p3, %p195_p0 }
  0x12   :  { %172 = vmatpush3.bf16.msra.mxu0 %v190_v5 }
  0x13   :  { %173 = vmatprep.subr.bf16.mxu0 %v218_v1 }
  0x16   :  { %174 = vmatpush3.bf16.msra.mxu0 %v191_v6 }
  0x17   :  { %175 = vmatprep.subr.bf16.mxu0 %v218_v1 }
  0x1a   :  { %176 = vmatpush3.bf16.msra.mxu0 %v192_v7 }
  0x1b   :  { %177 = vmatprep.subr.bf16.mxu0 %v218_v1 }
  0x1e   :  { %178 = vmatpush3.bf16.msra.mxu0 %v193_v8 }
  0x21   :  { %180 = vmatmul.mubr.bf16.vlgmr.msra.gmra.mrb[0].mxu0 %v17_v10 }
  0xf4   :  { %v123_v12 = vpop.f32.mrb[0].mxu0 }
  0xf5   :  { %v124_v13 = vadd.f32 %v145_v11, %v123_v12  ;;  %v181_v14 = vpop.f32.mrb[1].mxu0 }
  0xf6   :  { %v126_v15 = vpop.f32.mrb[2].mxu0 }
  0xf7   :  { %v182_v16 = vpop.f32.mrb[3].mxu0  ;;  %130 = vst.msk [vmem:[#allocation2] sm:$0xf] %vm129_vm1, %v124_v13 }
  0xf8   :  { %205 = shalt.err (!%p202_p4)
}
  0xf9   :  { %s206_s2 = scalar_lea.hbm %s286_s3, 64 }
  0xfa   :  { %p207_p5 = scmp.ne.s32.totalorder %s286_s3, %s206_s2  ;;  %p210_p6 = scmp.lt.u32.totalorder %s206_s2, %s286_s3 }
  0xfc   :  { %p212_p7 = pnand %p210_p6, %p207_p5 }
  0xfe   :  { %215 = shalt.err (!%p212_p7)
}
  0xff   :  { %140 = dma.vmem_to_hbm [thread:$0]  %s138_s6, 64, %s286_s3, [#allocation3]  }
 0x100   :  { %216 = dma.done.wait [#allocation3], 64  }
 0x101   :  { %217 = vsyncadd [#allocation3], 4294967232 }
 0x102   :  { %144 = vsyncpa [#allocation3], 1 }

</bundles_post_ra>
